<compile_context>
chip_gen: v7x
topology: tpu7x:2x2x1
jax: 0.10.0
libtpu: 0.0.40
codegen_flags: <defaults>
</compile_context>

<pallas_src>
import math
import functools

import jax
import jax.numpy as jnp
from jax import lax
from jax.experimental import pallas as pl
from jax.experimental.pallas import tpu as pltpu


# ---------------------------------------------------------------------------
# Fused kernel: grid = (B, H).  One grid step = one (batch, head) pair.
# The [B, S, D] output block is resident across the inner h axis and is used
# directly as the f32 accumulator for the per-head output-linear contributions.
# ---------------------------------------------------------------------------
def _mha_head_kernel(q_ref, k_ref, v_ref,
                     wq_ref, wk_ref, wv_ref,
                     bq_ref, bk_ref, bv_ref,
                     wo_ref, bo_ref,
                     out_ref, attn_ref,
                     *, d_k):
    h = pl.program_id(1)
    last_h = pl.num_programs(1) - 1

    # Activations and this head's projection weights, cast to bf16 at the MXU
    # boundary only (f32 accumulation preserved via preferred_element_type).
    q = q_ref[0].astype(jnp.bfloat16)            # (S, D)
    k = k_ref[0].astype(jnp.bfloat16)            # (S, D)
    v = v_ref[0].astype(jnp.bfloat16)            # (S, D)
    wq = wq_ref[0].astype(jnp.bfloat16)          # (D, d_k)
    wk = wk_ref[0].astype(jnp.bfloat16)          # (D, d_k)
    wv = wv_ref[0].astype(jnp.bfloat16)          # (D, d_v)

    scale = 1.0 / math.sqrt(d_k)
    Qh = (jnp.dot(q, wq, preferred_element_type=jnp.float32) + bq_ref[0]) * scale   # (S, d_k) f32
    Kh = jnp.dot(k, wk, preferred_element_type=jnp.float32) + bk_ref[0]             # (S, d_k) f32
    Vh = jnp.dot(v, wv, preferred_element_type=jnp.float32) + bv_ref[0]             # (S, d_v) f32

    # Q K^T without an explicit transpose: contract the last (d_k) dims directly.
    s = lax.dot_general(Qh.astype(jnp.bfloat16), Kh.astype(jnp.bfloat16),
                        (((1,), (1,)), ((), ())),
                        preferred_element_type=jnp.float32)                          # (S, S) f32

    # TODO(synk): an optional `mask` would be applied here, before max-subtraction.
    # Softmax entirely in f32; exact divide so the returned weights row-sum to 1.
    s = s - jnp.max(s, axis=-1, keepdims=True)
    p = jnp.exp(s)
    attn = p / jnp.sum(p, axis=-1, keepdims=True)                                    # (S, S) f32
    attn_ref[0, 0] = attn.astype(attn_ref.dtype)

    head_out = jnp.dot(attn.astype(jnp.bfloat16), Vh.astype(jnp.bfloat16),
                       preferred_element_type=jnp.float32)                           # (S, d_v) f32

    # Output linear as a per-head accumulation into the resident output block:
    # y = bo + sum_h head_out_h @ Wo[h*d_v:(h+1)*d_v, :]
    @pl.when(h == 0)
    def _():
        out_ref[0] = jnp.broadcast_to(bo_ref[...], out_ref.shape[1:])

    out_ref[0] += jnp.dot(head_out.astype(jnp.bfloat16),
                          wo_ref[0].astype(jnp.bfloat16),
                          preferred_element_type=jnp.float32)
    del last_h  # (output block is written every step; final value is at h == last_h)


def multi_head_attention(query, key, value, params):
    """query/key/value: [B, S, d_model] float32. Returns (output, attn_weights_stack)."""
    B, S, D = query.shape
    wq, wk, wv = params["wq"], params["wk"], params["wv"]              # [H, D, d_k]
    bq, bk, bv = params["bq"], params["bk"], params["bv"]              # [H, 1, d_k]
    wo, bo = params["wo"], params["bo"]                                # [H*d_v, D], [1, D]
    H, _, d_k = wq.shape
    d_v = wv.shape[-1]

    # Head-major view of the output projection: rows h*d_v..(h+1)*d_v-1 belong to head h
    # (matches torch.cat(head_outputs, dim=-1) ordering).
    wo_h = wo.reshape(H, d_v, D)

    act_spec = pl.BlockSpec((1, S, D), lambda b, h: (b, 0, 0))
    w_spec = lambda n: pl.BlockSpec((1, D, n), lambda b, h: (h, 0, 0))
    b_spec = lambda n: pl.BlockSpec((1, 1, n), lambda b, h: (h, 0, 0))

    output, attn = pl.pallas_call(
        functools.partial(_mha_head_kernel, d_k=d_k),
        out_shape=(jax.ShapeDtypeStruct((B, S, D), jnp.float32),
                   jax.ShapeDtypeStruct((B, H, S, S), jnp.float32)),
        grid=(B, H),
        in_specs=[act_spec, act_spec, act_spec,
                  w_spec(d_k), w_spec(d_k), w_spec(d_v),
                  b_spec(d_k), b_spec(d_k), b_spec(d_v),
                  pl.BlockSpec((1, d_v, D), lambda b, h: (h, 0, 0)),
                  pl.BlockSpec((1, D), lambda b, h: (0, 0))],
        out_specs=(pl.BlockSpec((1, S, D), lambda b, h: (b, 0, 0)),        # accumulator over h
                   pl.BlockSpec((1, 1, S, S), lambda b, h: (b, h, 0, 0))),
        compiler_params=pltpu.CompilerParams(
            dimension_semantics=("parallel", "arbitrary")),
    )(query, key, value, wq, wk, wv, bq, bk, bv, wo_h, bo)

    return output, attn


# ---------------------------------------------------------------------------
# Pure-JAX f32 reference (mirrors the PyTorch forward) for a correctness check.
# ---------------------------------------------------------------------------
def _reference(query, key, value, params):
    wq, wk, wv = params["wq"], params["wk"], params["wv"]
    bq, bk, bv = params["bq"], params["bk"], params["bv"]
    wo, bo = params["wo"], params["bo"]
    H, D, d_k = wq.shape
    outs, attns = [], []
    for h in range(H):
        Q = query @ wq[h] + bq[h]
        K = key @ wk[h] + bk[h]
        V = value @ wv[h] + bv[h]
        s = (Q @ jnp.swapaxes(K, -1, -2)) / math.sqrt(d_k)
        a = jax.nn.softmax(s, axis=-1)
        outs.append(a @ V)
        attns.append(a)
    concat = jnp.concatenate(outs, axis=-1)
    out = concat @ wo + bo[0]
    return out, jnp.stack(attns, axis=1)


if __name__ == "__main__":
    # Small shapes consistent with the module: d_model=32, num_heads=4, seq=8, batch=2.
    B, S, d_model, H = 2, 8, 32, 4
    d_k = d_v = d_model // H

    key0 = jax.random.PRNGKey(0)
    ks = jax.random.split(key0, 12)
    scale = 0.1

    params = {
        "wq": scale * jax.random.normal(ks[0], (H, d_model, d_k), jnp.float32),
        "wk": scale * jax.random.normal(ks[1], (H, d_model, d_k), jnp.float32),
        "wv": scale * jax.random.normal(ks[2], (H, d_model, d_v), jnp.float32),
        "bq": scale * jax.random.normal(ks[3], (H, 1, d_k), jnp.float32),
        "bk": scale * jax.random.normal(ks[4], (H, 1, d_k), jnp.float32),
        "bv": scale * jax.random.normal(ks[5], (H, 1, d_v), jnp.float32),
        "wo": scale * jax.random.normal(ks[6], (H * d_v, d_model), jnp.float32),
        "bo": scale * jax.random.normal(ks[7], (1, d_model), jnp.float32),
    }

    query = jax.random.normal(ks[8], (B, S, d_model), jnp.float32)
    kkey = jax.random.normal(ks[9], (B, S, d_model), jnp.float32)
    value = jax.random.normal(ks[10], (B, S, d_model), jnp.float32)

    out, attn = multi_head_attention(query, kkey, value, params)
    jax.block_until_ready((out, attn))

    ref_out, ref_attn = _reference(query, kkey, value, params)
    assert out.shape == (B, S, d_model) and attn.shape == (B, H, S, S)

    # Exact divide in-kernel => returned attention rows sum to 1 (tight check).
    assert jnp.allclose(jnp.sum(attn, axis=-1), 1.0, atol=1e-5)
    # bf16 MXU operands (f32 accumulation) vs the pure-f32 reference: tolerance
    # reflects bf16 rounding of the matmul inputs only.
    assert jnp.allclose(out, ref_out, atol=2e-2, rtol=2e-2)
    assert jnp.allclose(attn, ref_attn, atol=2e-2, rtol=2e-2)

    print("KERNEL_OK")
</pallas_src>

<mosaic_0001>
module attributes {stable_mosaic.version = 11 : i64} {
  func.func @_mha_head_kernel(%arg0: i32, %arg1: i32, %arg2: memref<1x8x32xf32, #tpu.memory_space<vmem>>, %arg3: memref<1x8x32xf32, #tpu.memory_space<vmem>>, %arg4: memref<1x8x32xf32, #tpu.memory_space<vmem>>, %arg5: memref<1x32x8xf32, #tpu.memory_space<vmem>>, %arg6: memref<1x32x8xf32, #tpu.memory_space<vmem>>, %arg7: memref<1x32x8xf32, #tpu.memory_space<vmem>>, %arg8: memref<1x1x8xf32, #tpu.memory_space<vmem>>, %arg9: memref<1x1x8xf32, #tpu.memory_space<vmem>>, %arg10: memref<1x1x8xf32, #tpu.memory_space<vmem>>, %arg11: memref<1x8x32xf32, #tpu.memory_space<vmem>>, %arg12: memref<1x32xf32, #tpu.memory_space<vmem>>, %arg13: memref<1x8x32xf32, #tpu.memory_space<vmem>>, %arg14: memref<1x1x8x8xf32, #tpu.memory_space<vmem>>) attributes {dimension_semantics = [#tpu.dimension_semantics<parallel>, #tpu.dimension_semantics<arbitrary>], iteration_bounds = array<i64: 2, 4>, scalar_prefetch = 0 : i64, scratch_operands = 0 : i64, tpu.core_type = #tpu.core_type<tc>, window_params = [{transform_indices = @transform_0, window_bounds = array<i64: 1, 8, 32>}, {transform_indices = @transform_1, window_bounds = array<i64: 1, 8, 32>}, {transform_indices = @transform_2, window_bounds = array<i64: 1, 8, 32>}, {transform_indices = @transform_3, window_bounds = array<i64: 1, 32, 8>}, {transform_indices = @transform_4, window_bounds = array<i64: 1, 32, 8>}, {transform_indices = @transform_5, window_bounds = array<i64: 1, 32, 8>}, {transform_indices = @transform_6, window_bounds = array<i64: 1, 1, 8>}, {transform_indices = @transform_7, window_bounds = array<i64: 1, 1, 8>}, {transform_indices = @transform_8, window_bounds = array<i64: 1, 1, 8>}, {transform_indices = @transform_9, window_bounds = array<i64: 1, 8, 32>}, {pipeline_mode = #tpu.pipeline_mode<synchronous>, transform_indices = @transform_10, window_bounds = array<i64: 1, 32>}, {transform_indices = @transform_11, window_bounds = array<i64: 1, 8, 32>}, {transform_indices = @transform_12, window_bounds = array<i64: 1, 1, 8, 8>}]} {
    %c0 = arith.constant 0 : index
    %c0_0 = arith.constant 0 : index
    %c0_1 = arith.constant 0 : index
    %0 = vector.load %arg2[%c0, %c0_0, %c0_1] : memref<1x8x32xf32, #tpu.memory_space<vmem>>, vector<1x8x32xf32>
    %1 = vector.shape_cast %0 : vector<1x8x32xf32> to vector<8x32xf32>
    %2 = arith.truncf %1 : vector<8x32xf32> to vector<8x32xbf16>
    %c0_2 = arith.constant 0 : index
    %c0_3 = arith.constant 0 : index
    %c0_4 = arith.constant 0 : index
    %3 = vector.load %arg3[%c0_2, %c0_3, %c0_4] : memref<1x8x32xf32, #tpu.memory_space<vmem>>, vector<1x8x32xf32>
    %4 = vector.shape_cast %3 : vector<1x8x32xf32> to vector<8x32xf32>
    %5 = arith.truncf %4 : vector<8x32xf32> to vector<8x32xbf16>
    %c0_5 = arith.constant 0 : index
    %c0_6 = arith.constant 0 : index
    %c0_7 = arith.constant 0 : index
    %6 = vector.load %arg4[%c0_5, %c0_6, %c0_7] : memref<1x8x32xf32, #tpu.memory_space<vmem>>, vector<1x8x32xf32>
    %7 = vector.shape_cast %6 : vector<1x8x32xf32> to vector<8x32xf32>
    %8 = arith.truncf %7 : vector<8x32xf32> to vector<8x32xbf16>
    %c0_8 = arith.constant 0 : index
    %c0_9 = arith.constant 0 : index
    %c0_10 = arith.constant 0 : index
    %9 = vector.load %arg5[%c0_8, %c0_9, %c0_10] : memref<1x32x8xf32, #tpu.memory_space<vmem>>, vector<1x32x8xf32>
    %10 = vector.shape_cast %9 : vector<1x32x8xf32> to vector<32x8xf32>
    %11 = arith.truncf %10 : vector<32x8xf32> to vector<32x8xbf16>
    %c0_11 = arith.constant 0 : index
    %c0_12 = arith.constant 0 : index
    %c0_13 = arith.constant 0 : index
    %12 = vector.load %arg6[%c0_11, %c0_12, %c0_13] : memref<1x32x8xf32, #tpu.memory_space<vmem>>, vector<1x32x8xf32>
    %13 = vector.shape_cast %12 : vector<1x32x8xf32> to vector<32x8xf32>
    %14 = arith.truncf %13 : vector<32x8xf32> to vector<32x8xbf16>
    %c0_14 = arith.constant 0 : index
    %c0_15 = arith.constant 0 : index
    %c0_16 = arith.constant 0 : index
    %15 = vector.load %arg7[%c0_14, %c0_15, %c0_16] : memref<1x32x8xf32, #tpu.memory_space<vmem>>, vector<1x32x8xf32>
    %16 = vector.shape_cast %15 : vector<1x32x8xf32> to vector<32x8xf32>
    %17 = arith.truncf %16 : vector<32x8xf32> to vector<32x8xbf16>
    %cst = arith.constant dense<0.000000e+00> : vector<8x8xf32>
    %18 = tpu.matmul %2, %11, %cst {dimension_numbers = #tpu.dot_dimension_numbers<[1], [0], [0], [1], [0, 0, 1, 1], [], []>} : vector<8x32xbf16>, vector<32x8xbf16>, vector<8x8xf32> -> vector<8x8xf32>
    %c0_17 = arith.constant 0 : index
    %c0_18 = arith.constant 0 : index
    %c0_19 = arith.constant 0 : index
    %19 = vector.load %arg8[%c0_17, %c0_18, %c0_19] : memref<1x1x8xf32, #tpu.memory_space<vmem>>, vector<1x1x8xf32>
    %20 = vector.shape_cast %19 : vector<1x1x8xf32> to vector<1x8xf32>
    %21 = vector.broadcast %20 : vector<1x8xf32> to vector<8x8xf32>
    %22 = arith.addf %18, %21 : vector<8x8xf32>
    %cst_20 = arith.constant 0.353553385 : f32
    %23 = vector.broadcast %cst_20 : f32 to vector<8x8xf32>
    %24 = arith.mulf %22, %23 : vector<8x8xf32>
    %cst_21 = arith.constant dense<0.000000e+00> : vector<8x8xf32>
    %25 = tpu.matmul %5, %14, %cst_21 {dimension_numbers = #tpu.dot_dimension_numbers<[1], [0], [0], [1], [0, 0, 1, 1], [], []>} : vector<8x32xbf16>, vector<32x8xbf16>, vector<8x8xf32> -> vector<8x8xf32>
    %c0_22 = arith.constant 0 : index
    %c0_23 = arith.constant 0 : index
    %c0_24 = arith.constant 0 : index
    %26 = vector.load %arg9[%c0_22, %c0_23, %c0_24] : memref<1x1x8xf32, #tpu.memory_space<vmem>>, vector<1x1x8xf32>
    %27 = vector.shape_cast %26 : vector<1x1x8xf32> to vector<1x8xf32>
    %28 = vector.broadcast %27 : vector<1x8xf32> to vector<8x8xf32>
    %29 = arith.addf %25, %28 : vector<8x8xf32>
    %cst_25 = arith.constant dense<0.000000e+00> : vector<8x8xf32>
    %30 = tpu.matmul %8, %17, %cst_25 {dimension_numbers = #tpu.dot_dimension_numbers<[1], [0], [0], [1], [0, 0, 1, 1], [], []>} : vector<8x32xbf16>, vector<32x8xbf16>, vector<8x8xf32> -> vector<8x8xf32>
    %c0_26 = arith.constant 0 : index
    %c0_27 = arith.constant 0 : index
    %c0_28 = arith.constant 0 : index
    %31 = vector.load %arg10[%c0_26, %c0_27, %c0_28] : memref<1x1x8xf32, #tpu.memory_space<vmem>>, vector<1x1x8xf32>
    %32 = vector.shape_cast %31 : vector<1x1x8xf32> to vector<1x8xf32>
    %33 = vector.broadcast %32 : vector<1x8xf32> to vector<8x8xf32>
    %34 = arith.addf %30, %33 : vector<8x8xf32>
    %35 = arith.truncf %24 : vector<8x8xf32> to vector<8x8xbf16>
    %36 = arith.truncf %29 : vector<8x8xf32> to vector<8x8xbf16>
    %cst_29 = arith.constant dense<0.000000e+00> : vector<8x8xf32>
    %37 = tpu.matmul %35, %36, %cst_29 {dimension_numbers = #tpu.dot_dimension_numbers<[1], [1], [0], [0], [0, 0, 1, 0], [], []>} : vector<8x8xbf16>, vector<8x8xbf16>, vector<8x8xf32> -> vector<8x8xf32>
    %cst_30 = arith.constant dense<0xFF800000> : vector<8xf32>
    %38 = vector.multi_reduction <maximumf>, %37, %cst_30 [1] : vector<8x8xf32> to vector<8xf32>
    %39 = vector.shape_cast %38 : vector<8xf32> to vector<8x1xf32>
    %40 = vector.broadcast %39 : vector<8x1xf32> to vector<8x8xf32>
    %41 = arith.subf %37, %40 : vector<8x8xf32>
    %42 = math.exp %41 : vector<8x8xf32>
    %cst_31 = arith.constant dense<0.000000e+00> : vector<8xf32>
    %43 = vector.multi_reduction <add>, %42, %cst_31 [1] : vector<8x8xf32> to vector<8xf32>
    %44 = vector.shape_cast %43 : vector<8xf32> to vector<8x1xf32>
    %45 = vector.broadcast %44 : vector<8x1xf32> to vector<8x8xf32>
    %46 = arith.divf %42, %45 : vector<8x8xf32>
    %c0_32 = arith.constant 0 : index
    %c0_33 = arith.constant 0 : index
    %c0_34 = arith.constant 0 : index
    %c0_35 = arith.constant 0 : index
    %47 = vector.load %arg14[%c0_32, %c0_33, %c0_34, %c0_35] : memref<1x1x8x8xf32, #tpu.memory_space<vmem>>, vector<1x1x8x8xf32>
    %48 = vector.shape_cast %47 : vector<1x1x8x8xf32> to vector<8x8xf32>
    %49 = vector.shape_cast %46 : vector<8x8xf32> to vector<1x1x8x8xf32>
    tpu.vector_store %arg14[%c0_32, %c0_33, %c0_34, %c0_35], %49 {strides = array<i32>} : memref<1x1x8x8xf32, #tpu.memory_space<vmem>>, vector<1x1x8x8xf32>,
    %50 = arith.truncf %46 : vector<8x8xf32> to vector<8x8xbf16>
    %51 = arith.truncf %34 : vector<8x8xf32> to vector<8x8xbf16>
    %cst_36 = arith.constant dense<0.000000e+00> : vector<8x8xf32>
    %52 = tpu.matmul %50, %51, %cst_36 {dimension_numbers = #tpu.dot_dimension_numbers<[1], [0], [0], [1], [0, 0, 1, 1], [], []>} : vector<8x8xbf16>, vector<8x8xbf16>, vector<8x8xf32> -> vector<8x8xf32>
    %c0_i32 = arith.constant 0 : i32
    %53 = arith.cmpi eq, %arg1, %c0_i32 : i32
    %54 = arith.extui %53 : i1 to i32
    %c0_i32_37 = arith.constant 0 : i32
    %55 = arith.cmpi ne, %54, %c0_i32_37 : i32
    scf.if %55 {
      %c0_48 = arith.constant 0 : index
      %c0_49 = arith.constant 0 : index
      %67 = vector.load %arg12[%c0_48, %c0_49] : memref<1x32xf32, #tpu.memory_space<vmem>>, vector<1x32xf32>
      %68 = vector.shape_cast %67 : vector<1x32xf32> to vector<1x32xf32>
      %69 = vector.broadcast %68 : vector<1x32xf32> to vector<8x32xf32>
      %c0_50 = arith.constant 0 : index
      %c0_51 = arith.constant 0 : index
      %c0_52 = arith.constant 0 : index
      %70 = vector.load %arg13[%c0_50, %c0_51, %c0_52] : memref<1x8x32xf32, #tpu.memory_space<vmem>>, vector<1x8x32xf32>
      %71 = vector.shape_cast %70 : vector<1x8x32xf32> to vector<8x32xf32>
      %72 = vector.shape_cast %69 : vector<8x32xf32> to vector<1x8x32xf32>
      tpu.vector_store %arg13[%c0_50, %c0_51, %c0_52], %72 {strides = array<i32>} : memref<1x8x32xf32, #tpu.memory_space<vmem>>, vector<1x8x32xf32>,
    } else {
    }
    %c0_38 = arith.constant 0 : index
    %c0_39 = arith.constant 0 : index
    %c0_40 = arith.constant 0 : index
    %56 = vector.load %arg13[%c0_38, %c0_39, %c0_40] : memref<1x8x32xf32, #tpu.memory_space<vmem>>, vector<1x8x32xf32>
    %57 = vector.shape_cast %56 : vector<1x8x32xf32> to vector<8x32xf32>
    %58 = arith.truncf %52 : vector<8x8xf32> to vector<8x8xbf16>
    %c0_41 = arith.constant 0 : index
    %c0_42 = arith.constant 0 : index
    %c0_43 = arith.constant 0 : index
    %59 = vector.load %arg11[%c0_41, %c0_42, %c0_43] : memref<1x8x32xf32, #tpu.memory_space<vmem>>, vector<1x8x32xf32>
    %60 = vector.shape_cast %59 : vector<1x8x32xf32> to vector<8x32xf32>
    %61 = arith.truncf %60 : vector<8x32xf32> to vector<8x32xbf16>
    %cst_44 = arith.constant dense<0.000000e+00> : vector<8x32xf32>
    %62 = tpu.matmul %58, %61, %cst_44 {dimension_numbers = #tpu.dot_dimension_numbers<[1], [0], [0], [1], [0, 0, 1, 1], [], []>} : vector<8x8xbf16>, vector<8x32xbf16>, vector<8x32xf32> -> vector<8x32xf32>
    %63 = arith.addf %57, %62 : vector<8x32xf32>
    %c0_45 = arith.constant 0 : index
    %c0_46 = arith.constant 0 : index
    %c0_47 = arith.constant 0 : index
    %64 = vector.load %arg13[%c0_45, %c0_46, %c0_47] : memref<1x8x32xf32, #tpu.memory_space<vmem>>, vector<1x8x32xf32>
    %65 = vector.shape_cast %64 : vector<1x8x32xf32> to vector<8x32xf32>
    %66 = vector.shape_cast %63 : vector<8x32xf32> to vector<1x8x32xf32>
    tpu.vector_store %arg13[%c0_45, %c0_46, %c0_47], %66 {strides = array<i32>} : memref<1x8x32xf32, #tpu.memory_space<vmem>>, vector<1x8x32xf32>,
    return
  }
  func.func @transform_0(%arg0: i32, %arg1: i32) -> (i32, i32, i32) {
    %c0_i32 = arith.constant 0 : i32
    %c0_i32_0 = arith.constant 0 : i32
    %c0_i32_1 = arith.constant 0 : i32
    return %arg0, %c0_i32, %c0_i32_0 : i32, i32, i32
  }
  func.func @transform_1(%arg0: i32, %arg1: i32) -> (i32, i32, i32) {
    %c0_i32 = arith.constant 0 : i32
    %c0_i32_0 = arith.constant 0 : i32
    %c0_i32_1 = arith.constant 0 : i32
    return %arg0, %c0_i32, %c0_i32_0 : i32, i32, i32
  }
  func.func @transform_2(%arg0: i32, %arg1: i32) -> (i32, i32, i32) {
    %c0_i32 = arith.constant 0 : i32
    %c0_i32_0 = arith.constant 0 : i32
    %c0_i32_1 = arith.constant 0 : i32
    return %arg0, %c0_i32, %c0_i32_0 : i32, i32, i32
  }
  func.func @transform_3(%arg0: i32, %arg1: i32) -> (i32, i32, i32) {
    %c0_i32 = arith.constant 0 : i32
    %c0_i32_0 = arith.constant 0 : i32
    %c0_i32_1 = arith.constant 0 : i32
    return %arg1, %c0_i32, %c0_i32_0 : i32, i32, i32
  }
  func.func @transform_4(%arg0: i32, %arg1: i32) -> (i32, i32, i32) {
    %c0_i32 = arith.constant 0 : i32
    %c0_i32_0 = arith.constant 0 : i32
    %c0_i32_1 = arith.constant 0 : i32
    return %arg1, %c0_i32, %c0_i32_0 : i32, i32, i32
  }
  func.func @transform_5(%arg0: i32, %arg1: i32) -> (i32, i32, i32) {
    %c0_i32 = arith.constant 0 : i32
    %c0_i32_0 = arith.constant 0 : i32
    %c0_i32_1 = arith.constant 0 : i32
    return %arg1, %c0_i32, %c0_i32_0 : i32, i32, i32
  }
  func.func @transform_6(%arg0: i32, %arg1: i32) -> (i32, i32, i32) {
    %c0_i32 = arith.constant 0 : i32
    %c0_i32_0 = arith.constant 0 : i32
    %c0_i32_1 = arith.constant 0 : i32
    return %arg1, %c0_i32, %c0_i32_0 : i32, i32, i32
  }
  func.func @transform_7(%arg0: i32, %arg1: i32) -> (i32, i32, i32) {
    %c0_i32 = arith.constant 0 : i32
    %c0_i32_0 = arith.constant 0 : i32
    %c0_i32_1 = arith.constant 0 : i32
    return %arg1, %c0_i32, %c0_i32_0 : i32, i32, i32
  }
  func.func @transform_8(%arg0: i32, %arg1: i32) -> (i32, i32, i32) {
    %c0_i32 = arith.constant 0 : i32
    %c0_i32_0 = arith.constant 0 : i32
    %c0_i32_1 = arith.constant 0 : i32
    return %arg1, %c0_i32, %c0_i32_0 : i32, i32, i32
  }
  func.func @transform_9(%arg0: i32, %arg1: i32) -> (i32, i32, i32) {
    %c0_i32 = arith.constant 0 : i32
    %c0_i32_0 = arith.constant 0 : i32
    %c0_i32_1 = arith.constant 0 : i32
    return %arg1, %c0_i32, %c0_i32_0 : i32, i32, i32
  }
  func.func @transform_10(%arg0: i32, %arg1: i32) -> (i32, i32) {
    %c0_i32 = arith.constant 0 : i32
    %c0_i32_0 = arith.constant 0 : i32
    %c0_i32_1 = arith.constant 0 : i32
    return %c0_i32, %c0_i32_0 : i32, i32
  }
  func.func @transform_11(%arg0: i32, %arg1: i32) -> (i32, i32, i32) {
    %c0_i32 = arith.constant 0 : i32
    %c0_i32_0 = arith.constant 0 : i32
    %c0_i32_1 = arith.constant 0 : i32
    return %arg0, %c0_i32, %c0_i32_0 : i32, i32, i32
  }
  func.func @transform_12(%arg0: i32, %arg1: i32) -> (i32, i32, i32, i32) {
    %c0_i32 = arith.constant 0 : i32
    %c0_i32_0 = arith.constant 0 : i32
    %c0_i32_1 = arith.constant 0 : i32
    return %arg0, %arg1, %c0_i32, %c0_i32_0 : i32, i32, i32, i32
  }
}

</mosaic_0001>

<bundles_post_ra>
// kernel: tpu_custom_call.1
= control target key start
LH: loop header
LB: loop body
LE: loop exit
PB: predicated region body
PF: predicated region fallthrough
CT: control target
= control target key end

     0   :  { %s1920_s0 = inlined_call_operand.vmem [shape: f32[2,8,32], index: 0, kind: input, shape index: {}]   ;;  %s1921_s1 = inlined_call_operand.vmem [shape: f32[2,8,32], index: 1, kind: input, shape index: {}]   ;;  %s1922_s2 = inlined_call_operand.vmem [shape: f32[2,8,32], index: 2, kind: input, shape index: {}]   ;;  %s1923_s3 = inlined_call_operand.vmem [shape: f32[4,32,8], index: 3, kind: input, shape index: {}]   ;;  %s1924_s4 = inlined_call_operand.vmem [shape: f32[4,32,8], index: 4, kind: input, shape index: {}]   ;;  %s1925_s5 = inlined_call_operand.vmem [shape: f32[4,32,8], index: 5, kind: input, shape index: {}]   ;;  %s1926_s6 = inlined_call_operand.vmem [shape: f32[4,1,8], index: 6, kind: input, shape index: {}]   ;;  %s1927_s7 = inlined_call_operand.vmem [shape: f32[4,1,8], index: 7, kind: input, shape index: {}]   ;;  %s1928_s8 = inlined_call_operand.vmem [shape: f32[4,1,8], index: 8, kind: input, shape index: {}]   ;;  %s1929_s9 = inlined_call_operand.vmem [shape: f32[4,8,32], index: 9, kind: input, shape index: {}]   ;;  %s1930_s10 = inlined_call_operand.vmem [shape: f32[1,32], index: 10, kind: input, shape index: {}]   ;;  %s1931_s11 = inlined_call_operand.hbm [shape: f32[2,8,32], index: 11, kind: output, shape index: {0}]   ;;  %s1932_s12 = inlined_call_operand.hbm [shape: f32[2,4,8,8], index: 12, kind: output, shape index: {1}]  }
   0x1   :  { %1946 = sst [smem:[#allocation19_spill]] %s1920_s0 }
   0x2   :  { %1947 = sst [smem:[#allocation20_spill]] %s1921_s1 }
   0x3   :  { %1948 = sst [smem:[#allocation21_spill]] %s1928_s8 }
   0x4   :  { %1949 = sst [smem:[#allocation22_spill]] %s1930_s10 }
   0x5   :  { %1950 = sst [smem:[#allocation23_spill]] %s1931_s11 }
   0x6   :  { %1951 = sst [smem:[#allocation24_spill]] %s1932_s12 }
   0x7   :  { %18 = vsyncpa [#allocation3], 0 }
   0x8   :  { %20 = vsyncpa [#allocation3 + $0x1], 0 }
   0x9   :  { %21 = vsyncpa [#allocation5], 0 }
   0xa   :  { %23 = vsyncpa [#allocation5 + $0x1], 0  ;;  %s1597_s21 = smov 0   ;;  %s1599_s22 = smov 0  }
   0xb   :  { %s1601_s23 = smov 0   ;;  %s1603_s24 = smov 0  }
   0xc   :  { %s1605_s25 = smov 0   ;;  %s1607_s26 = smov 0  }
   0xd   :  { %s1609_s27 = smov 0   ;;  %s1611_s28 = smov 0  }
   0xe   :  { %s1613_s29 = smov 0   ;;  %s1615_s30 = smov 0  }
   0xf   :  { %s1617_s13 = smov 0  }
  0x10 LB: > { %1952 = sst [smem:[#allocation8_spill]] %s1494_s23  ;;  %s1175_s14 = sadd.s32 4294967295, %s1526_s13   ;;  %s1526_s13 = sphi %s1617_s13, %s29_s13   ;;  %s1522_s30 = sphi %s1615_s30, %s1987_s30   ;;  %s1518_s29 = sphi %s1613_s29, %s1986_s29   ;;  %s1514_s28 = sphi %s1611_s28, %s1994_s28   ;;  %s1510_s27 = sphi %s1609_s27, %s1993_s27   ;;  %s1506_s26 = sphi %s1607_s26, %s1992_s26   ;;  %s1502_s25 = sphi %s1605_s25, %s1991_s25   ;;  %s1498_s24 = sphi %s1603_s24, %s1990_s24   ;;  %s1494_s23 = sphi %s1601_s23, %s1981_s23   ;;  %s1490_s22 = sphi %s1599_s22, %s1989_s22   ;;  %s1486_s21 = sphi %s1597_s21, %s1988_s21  }
  0x11   : > { %1953 = sst [smem:[#allocation9_spill]] %s1498_s24  ;;  %s1176_s15 = sadd.s32 4294967294, %s1526_s13  }
  0x12   : > { %1954 = sst [smem:[#allocation10_spill]] %s1506_s26  ;;  %s38_s16 = sadd.s32 1, %s1518_s29 }
  0x13   : > { %1955 = sst [smem:[#allocation11_spill]] %s1518_s29  ;;  %s41_s17 = sadd.s32 1, %s1522_s30 }
  0x14   : > { %1956 = sst [smem:[#allocation12_spill]] %s1522_s30  ;;  %p39_p0 = scmp.ge.s32.totalorder %s38_s16, 4 }
  0x15   : > { %s329_s18 = sadd.s32 1, %s1506_s26  ;;  %p339_p1 = scmp.ne.s32.totalorder %s1506_s26, %s1502_s25 }
  0x16   : > { %p1659_p2 = scmp.eq.s32.totalorder %s1175_s14, 7  ;;  %s1996_s16 = smov (%p39_p0, %s38_s16), 0 }
  0x17   : > { %1958 = sst [smem:[#allocation13_spill]] %s1996_s16  ;;  %s1998_s17 = smov (!%p39_p0, %s41_s17), %s1522_s30 }
  0x18   : > { %p1668_p3 = por %p1659_p2, %p339_p1  ;;  %p345_p4 = scmp.ne.s32.totalorder %s1502_s25, %s1498_s24 }
  0x19   : > { %p43_p5 = scmp.ge.s32.totalorder %s1998_s17, 2  ;;  %p1674_p6 = scmp.eq.s32.totalorder %s1176_s15, 7 }
  0x1a   : > { %s1959_s20 = scalar_select %p1668_p3, 1, 0 }
  0x1b   : > { %s353_s11 = ssub.s32 %s1518_s29, %s1996_s16  ;;  %s357_s12 = sadd.s32 1, %s1494_s23 }
  0x1c   : > { %1960 = sst [smem:[#allocation14_spill]] %s1959_s20  ;;  %s2000_s17 = smov (%p43_p5, %s1998_s17), 0 }
  0x1d   : > { %1962 = sst [smem:[#allocation15_spill]] %s2000_s17  ;;  %p1685_p7 = por %p1674_p6, %p345_p4 }
  0x1e   : > { %p367_p8 = scmp.ne.s32.totalorder %s1494_s23, %s1490_s22  ;;  %s326_s24 = ssub.s32 %s1522_s30, %s2000_s17 }
  0x1f   : > { %p373_p9 = scmp.ne.s32.totalorder %s1490_s22, %s1486_s21  ;;  %p327_p10 = scmp.eq.s32.totalorder %s326_s24, 0 }
  0x20   : > { %s354_s15 = sor.u32 %s353_s11, %s326_s24  ;;  %p1697_p12 = por %p367_p8, %p1659_p2 }
  0x21   : > { %p355_p11 = scmp.eq.s32.totalorder %s354_s15, 0  ;;  %p1709_p13 = por %p373_p9, %p1674_p6 }
  0x22   : > { %s1702_s16 = scalar_select %p327_p10, %s1506_s26, %s329_s18  }
  0x23   : > { %s1705_s29 = scalar_select %p355_p11, %s1494_s23, %s357_s12  }
  0x24   : > { %1965 = sst [smem:[#allocation16_spill]] %s1702_s16  ;;  %p1179_p0 = scmp.ge.s32.totalorder %s1526_s13, 1 }
  0x25   : > { %1966 = sst [smem:[#allocation17_spill]] %s1705_s29  ;;  %p465_p1 = scmp.lt.s32.totalorder %s1526_s13, 9 }
  0x26   : > { %s1967_s8 = scalar_select %p1709_p13, 1, 0 }
  0x27   : > { %p466_p4 = pnand %p1179_p0, %p465_p1 }
  0x28   : > { %1968 = sst [smem:[#allocation18_spill]] %s1967_s8  ;;  %p559_p2 = scmp.lt.s32.totalorder (!%p466_p4), %s1510_s27, 3  ;;  %v1528_v0 = vmov (!%p466_p4), 0.0   ;;  %vm1529_vm0 = vmmov (!%p466_p4), 0   ;;  %vm619_vm1 = vcmask (!%p466_p4), 261120   ;;  %vm766_vm2 = vcmask (!%p466_p4), 64512  }
  0x29   : > { %469 = sbr.rel (%p466_p4) target bundleno = 1264 (0x4f0), region = 64  ;;  %s1940_s11 = sand.u32 (!%p466_p4), 1, %s1502_s25   ;;  %1236 = vmatprep.subr.bf16.mxu1 (!%p466_p4), %v1528_v0  ;;  %1228 = vmatprep.subr.bf16.mxu0 (!%p466_p4), %v1528_v0  ;;  %vm830_vm3 = vcmask (!%p466_p4), 1043456  }
  0x2a   : > { %s1720_s12 = sshll.u32 (!%p466_p4), %s1940_s11, 3  ;;  %1240 = vmatprep.mubr.msk.bf16.mxu1 (!%p466_p4), %vm1529_vm0, %v1528_v0  ;;  %1232 = vmatprep.mubr.msk.bf16.mxu0 (!%p466_p4), %vm1529_vm0, %v1528_v0  ;;  %p547_p5 = scmp.lt.s32.totalorder (!%p466_p4), %s1514_s28, 1 }
  0x2b   : > { %s1969_s1 = sld [smem:[#allocation20_spill]] (!%p466_p4)  ;;  %s1970_s0 = sld [smem:[#allocation19_spill]] (!%p466_p4) }
  0x2c   : > { %s1971_s26 = sld [smem:[#allocation21_spill]] (!%p466_p4)  ;;  %p1200_p6 = scmp.ne.s32.totalorder (!%p466_p4), %s1510_s27, 0 }
  0x30   : > { %s1724_s24 = scalar_select %p559_p2, %s1510_s27, 3 }
  0x31   : > { %s548_s8 = scalar_select %p547_p5, %s1514_s28, 1 }
  0x32   : > { %s1732_s18 = sshll.u32 %s1724_s24, 5  ;;  %s1191_s19 = sshll.u32 %s1724_s24, 3 }
  0x33   : > { %s568_s11 = scalar_lea.vmem %s1924_s4, %s1732_s18  ;;  %s1742_s16 = scalar_lea.vmem %s1929_s9, %s1191_s19 }
  0x34   : > { %v600_v1 = vld [vmem:[%s568_s11] sm:$0xff]  ;;  %v601_v2 = vld [vmem:[%s568_s11 + $0x8] sm:$0xff]  ;;  %s563_s23 = scalar_lea.vmem %s1923_s3, %s1732_s18  ;;  %v602_v3 = vld [vmem:[%s568_s11 + $0x10] sm:$0xff]  ;;  %s1749_s30 = sshll.u32 %s548_s8, 3 }
  0x35   : > { %v604_v4 = vpack.c.bf16 %v601_v2, %v600_v1  ;;  %v594_v5 = vld [vmem:[%s563_s23] sm:$0xff]  ;;  %v595_v6 = vld [vmem:[%s563_s23 + $0x8] sm:$0xff]  ;;  %v603_v7 = vld [vmem:[%s568_s11 + $0x18] sm:$0xff]  ;;  %s554_s17 = scalar_lea.vmem %s1969_s1, %s1749_s30  ;;  %s550_s14 = scalar_lea.vmem %s1970_s0, %s1749_s30 }
  0x36   : > { %v598_v8 = vpack.c.bf16 %v595_v6, %v594_v5  ;;  %v596_v9 = vld [vmem:[%s563_s23 + $0x10] sm:$0xff]  ;;  %v597_v10 = vld [vmem:[%s563_s23 + $0x18] sm:$0xff]  ;;  %v605_v11 = vpack.c.bf16 %v603_v7, %v602_v3  ;;  %v590_v13 = vld [vmem:[%s554_s17] sm:$0xff]  ;;  %s579_s15 = scalar_lea.vmem %s1927_s7, %s1724_s24  ;;  %s576_s17 = scalar_lea.vmem %s1926_s6, %s1724_s24 }
  0x37   : > { %1237 = vmatpush3.bf16.msra.mxu1 %v604_v4  ;;  %v599_v12 = vpack.c.bf16 %v597_v10, %v596_v9  ;;  %v588_v14 = vld [vmem:[%s550_s14] sm:$0xff]  ;;  %v591_v15 = vpack.c.bf16 %v590_v13, %v590_v13  ;;  %s573_s14 = scalar_lea.vmem %s1925_s5, %s1732_s18  ;;  %s582_s29 = scalar_lea.vmem %s1971_s26, %s1724_s24 }
  0x38   : > { %1238 = vmatprep.subr.bf16.mxu1 %v1528_v0  ;;  %1229 = vmatpush3.bf16.msra.mxu0 %v598_v8  ;;  %v589_v16 = vpack.c.bf16 %v588_v14, %v588_v14  ;;  %v1194_v17 = vld [vmem:[%s579_s15] ss:$0 sm:$0xff]  ;;  %v607_v34 = vld [vmem:[%s573_s14 + $0x8] sm:$0xff]  ;;  %v608_v35 = vld [vmem:[%s573_s14 + $0x10] sm:$0xff]  ;;  %s558_s15 = scalar_lea.vmem %s1922_s2, %s1749_s30  ;;  %s1805_s24 = scalar_lea.vmem [#allocation2], %s1720_s12 }
  0x39   : > { %1230 = vmatprep.subr.bf16.mxu0 %v1528_v0  ;;  %v1192_v18 = vld [vmem:[%s576_s17] ss:$0 sm:$0xff]  ;;  %v609_v37 = vld [vmem:[%s573_s14 + $0x18] sm:$0xff]  ;;  %s544_s17 = sand.u32 1, %s1490_s22   ;;  %s1972_s23 = sld [smem:[#allocation22_spill]] (!%p1200_p6) }
  0x3a   : > { %v606_v33 = vld [vmem:[%s573_s14] sm:$0xff]  ;;  %v611_v38 = vpack.c.bf16 %v609_v37, %v608_v35  ;;  %s1181_s19 = sshll.u32 %s544_s17, 3 }
  0x3b   : > { %1239 = vmatpush3.bf16.msra.mxu1 %v605_v11  ;;  %v610_v36 = vpack.c.bf16 %v607_v34, %v606_v33  ;;  %v592_v39 = vld [vmem:[%s558_s15] sm:$0xff]  ;;  %s546_s11 = scalar_lea.vmem [#allocation4], %s1181_s19 }
  0x3c   : > { %1231 = vmatpush3.bf16.msra.mxu0 %v599_v12  ;;  %1252 = vmatprep.subr.bf16.mxu1 %v1528_v0  ;;  %v593_v40 = vpack.c.bf16 %v592_v39, %v592_v39  ;;  %v1196_v54 = vld [vmem:[%s582_s29] ss:$0 sm:$0xff] }
  0x3d   : > { %1244 = vmatprep.subr.bf16.mxu0 %v1528_v0 }
  0x3e   : > { %1241 = vmatmul.mubr.msk.bf16.vlgmr.msra.gmra.mrb[0].mxu1 %vm619_vm1, %v591_v15 }
  0x3f   : > { %1233 = vmatmul.mubr.msk.bf16.vlgmr.msra.gmra.mrb[0].mxu0 %vm619_vm1, %v589_v16  ;;  %1254 = vmatprep.mubr.msk.bf16.mxu1 %vm1529_vm0, %v1528_v0  ;;  %v1201_v4 = vld [vmem:[%s1972_s23] ss:$0 sm:$0xff] (!%p1200_p6) }
  0x40   : > { %1248 = vmatprep.mubr.msk.bf16.mxu0 %vm1529_vm0, %v1528_v0  ;;  %1245 = vmatpush3.bf16.msra.mxu0 %v610_v36  ;;  %885 = vst.msk [vmem:[%s1805_s24] sm:$0xff] (!%p1200_p6), %vm619_vm1, %v1201_v4 }
  0x41   : > { %1246 = vmatprep.subr.bf16.mxu0 %v1528_v0 }
  0x44   : > { %1247 = vmatpush3.bf16.msra.mxu0 %v611_v38 }
  0x45   : > { %1258 = vmatprep.subr.bf16.mxu0 %v1528_v0 }
  0x47   : > { %1249 = vmatmul.mubr.msk.bf16.vlgmr.msra.gmra.mrb[4].mxu0 %vm619_vm1, %v593_v40 }
  0x48   : > { %1260 = vmatprep.mubr.msk.bf16.mxu0 %vm1529_vm0, %v1528_v0 }
 0x111   : > { %v708_v19 = vpop.f32.mrb[0].mxu1 }
 0x112   : > { %v709_v20 = vadd.f32 %v1194_v17, %v708_v19  ;;  %v1242_v21 = vpop.f32.mrb[1].mxu1  ;;  %v657_v22 = vpop.f32.mrb[0].mxu0 }
 0x113   : > { %v711_v23 = vpop.f32.mrb[2].mxu1  ;;  %v658_v24 = vadd.f32 %v1192_v18, %v657_v22  ;;  %v1234_v25 = vpop.f32.mrb[1].mxu0 }
 0x114   : > { %v765_v26 = vpack.c.bf16 %v709_v20, %v709_v20  ;;  %v1243_v27 = vpop.f32.mrb[3].mxu1  ;;  %v660_v28 = vpop.f32.mrb[2].mxu0 }
 0x115   : > { %v1235_v29 = vpop.f32.mrb[3].mxu0  ;;  %v663_v31 = vmul.f32 0.35355338, %v658_v24 }
 0x116   : > { %v771_v30 = vsel %vm766_vm2, %v765_v26, 0 }
 0x117   : > { %1253 = vmatpush3.bf16.xpose.msra.mxu1 %v771_v30  ;;  %v764_v32 = vpack.c.bf16 %v663_v31, %v663_v31 }
 0x11a   : > { %v758_v51 = vpop.f32.mrb[4].mxu0 }
 0x11b   : > { %v1250_v52 = vpop.f32.mrb[5].mxu0  ;;  %v759_v56 = vadd.f32 %v1196_v54, %v758_v51 }
 0x11c   : > { %v761_v53 = vpop.f32.mrb[6].mxu0 }
 0x11d   : > { %v1251_v55 = vpop.f32.mrb[7].mxu0  ;;  %v826_v57 = vpack.c.bf16 %v759_v56, %v759_v56 }
 0x11e   : > { %1255 = vmatmul.mubr.msk.bf16.vlgmr.msra.gmra.mrb[4].mxu1 %vm766_vm2, %v764_v32 }
 0x11f   : > { %v832_v58 = vsel %vm830_vm3, %v826_v57, 0 }
 0x120   : > { %1259 = vmatpush3.bf16.msra.mxu0 %v832_v58 }
 0x1f1   : > { %v807_v41 = vpop.f32.mrb[4].mxu1 }
 0x1f2   : > { %v1256_v42 = vpop.f32.mrb[5].mxu1  ;;  %v813_v43 = vsel %vm766_vm2, %v807_v41, -inf }
 0x1f3   : > { %814 = vmax.xlane.f32.xlu0 %v813_v43  ;;  %v810_v44 = vpop.f32.mrb[6].mxu1 }
 0x1f4   : > { %v1257_v45 = vpop.f32.mrb[7].mxu1 }
 0x280   : > { %v815_v46 = vpop.xlane.xlu0 %814 }
 0x281   : > { %v816_v47 = vsub.f32 %v807_v41, %v815_v46 }
 0x283   : > { %v817_v48 = vmul.f32 1.442695, %v816_v47 }
 0x285   : > { %1372 = vpow2.f32 %v817_v48 }
 0x28f   : > { %v1373_v49 = vpop.eup %1372 }
 0x290   : > { %v819_v50 = vsel %vm766_vm2, %v1373_v49, 0.0 }
 0x291   : > { %820 = vadd.xlane.f32.xlu0 %v819_v50 }
 0x31e   : > { %v821_v59 = vpop.xlane.xlu0 %820 }
 0x31f   : > { %1374 = vrcp.f32 %v821_v59 }
 0x329   : > { %v1375_v60 = vpop.eup %1374 }
 0x32a   : > { %v823_v61 = vmul.f32 %v1375_v60, %v1373_v49 }
 0x32c   : > { %824 = vst.msk [vmem:[%s546_s11] sm:$0xff] %vm766_vm2, %v823_v61  ;;  %v825_v62 = vpack.c.bf16 %v823_v61, %v823_v61 }
 0x32e   : > { %1261 = vmatmul.mubr.msk.bf16.vlgmr.msra.gmra.mrb[8].mxu0 %vm766_vm2, %v825_v62 }
 0x3fe   : > { %877 = sbr.rel (%p1200_p6) target bundleno = 1029 (0x405), region = 68 }
 0x401   : > { %v868_v63 = vpop.f32.mrb[8].mxu0 }
 0x402   : > { %v1262_v1 = vpop.f32.mrb[9].mxu0 }
 0x403   : > { %v871_v2 = vpop.f32.mrb[10].mxu0 }
 0x404   : > { %v1263_v3 = vpop.f32.mrb[11].mxu0 }
 0x405 PF: > { %1264 = vmatprep.subr.bf16.mxu1 %v1528_v0  ;;  %v888_v5 = vld [vmem:[%s1742_s16] sm:$0xff]  ;;  %1266 = vmatprep.mubr.msk.bf16.mxu1 %vm1529_vm0, %v1528_v0  ;;  %v887_v8 = vpack.c.bf16 %v868_v63, %v868_v63  ;;  %s1206_s12 = sshll.u32 %s1514_s28, 2  ;;  %s972_s30 = sshll.u32 %s546_s11, 4  ;;  %s973_s30 = int_to_ptr.vmem [resolvable:$true] %s972_s30 }
 0x406   : > { %v889_v6 = vpack.c.bf16 %v888_v5, %v888_v5  ;;  %s968_s15 = sadd.s32 %s1510_s27, %s1206_s12  ;;  %s1973_s19 = sld [smem:[#allocation24_spill]] }
 0x407   : > { %s1207_s18 = sshll.u32 %s968_s15, 7  ;;  %s944_s16 = scalar_lea.sflag [#allocation5], %s544_s17 }
 0x408   : > { %v894_v7 = vsel %vm830_vm3, %v889_v6, 0  ;;  %s1376_s8 = scalar_lea.vmem %s973_s30, 128  ;;  %s1530_s23 = smov [#allocation4]  }
 0x409   : > { %1265 = vmatpush3.bf16.msra.mxu1 %v894_v7  ;;  %p1377_p8 = scmp.ne.s32.totalorder %s973_s30, %s1376_s8  ;;  %s1380_s0 = sshll.u32 %s1530_s23, 4  ;;  %s1381_s0 = int_to_ptr.vmem [resolvable:$false] %s1380_s0 }
 0x40a   : > { %s1382_s1 = scalar_lea.vmem %s1381_s0, 256  ;;  %p1383_p11 = scmp.lt.s32.totalorder %s973_s30, %s1381_s0 }
 0x40b   : > { %p1378_p9 = pnand %p1377_p8, %p1697_p12  ;;  %p1384_p0 = scmp.lt.s32.totalorder %s1382_s1, %s1376_s8 }
 0x40c   : > { %1267 = vmatmul.mubr.msk.bf16.vlgmr.msra.gmra.mrb[8].mxu1 %vm766_vm2, %v887_v8  ;;  %s1824_s14 = scalar_lea.hbm %s1973_s19, %s1207_s18 }
 0x40d   : > { %p1379_p10 = pneg %p1378_p9  ;;  %p1385_p1 = por %p1384_p0, %p1383_p11 }
 0x40f   : > { %p1386_p4 = pnand %p1385_p1, %p1379_p10 }
 0x411   : > { %1389 = shalt.err (!%p1386_p4)
}
 0x412   : > { %s1390_s27 = scalar_lea.hbm %s1824_s14, 128  ;;  %s1394_s12 = scalar_lea.hbm %s1973_s19, 1024 }
 0x413   : > { %p1391_p2 = scmp.ne.s32.totalorder %s1824_s14, %s1390_s27  ;;  %p1395_p8 = scmp.lt.u32.totalorder %s1824_s14, %s1973_s19 }
 0x414   : > { %p1396_p9 = scmp.lt.u32.totalorder %s1394_s12, %s1390_s27  ;;  %p1398_p11 = scmp.lt.u32.totalorder %s1390_s27, %s1824_s14 }
 0x415   : > { %p1392_p5 = pnand %p1391_p2, %p1697_p12 }
 0x416   : > { %p1397_p10 = por %p1396_p9, %p1395_p8 }
 0x417   : > { %p1393_p6 = pneg %p1392_p5 }
 0x418   : > { %p1399_p0 = por %p1398_p11, %p1397_p10 }
 0x41a   : > { %p1400_p1 = pnand %p1399_p0, %p1393_p6 }
 0x41c   : > { %1403 = shalt.err (!%p1400_p1)
}
 0x41d   : > { %1271 = dma.vmem_to_hbm [thread:$0]  (%p1697_p12), %s973_s30, 128, %s1824_s14, %s944_s16   ;;  %v886_v0 = vld [vmem:[%s1805_s24] sm:$0xff] }
 0x41e   : > { %s1205_s18 = sshll.u32 %s1514_s28, 7  ;;  %s957_s26 = sshll.u32 %s1805_s24, 4  ;;  %s1853_s26 = int_to_ptr.vmem [resolvable:$true] %s957_s26 }
 0x41f   : > { %s1975_s23 = sld [smem:[#allocation23_spill]]  ;;  %s1977_s20 = sand.u32 1, %s1502_s25  }
 0x420   : > { %s939_s28 = scalar_lea.sflag [#allocation3], %s1977_s20  ;;  %s1404_s30 = scalar_lea.vmem %s1853_s26, 128 }
 0x421   : > { %p1405_p12 = scmp.ne.s32.totalorder %s1853_s26, %s1404_s30  ;;  %s1531_s14 = smov [#allocation2]  }
 0x422   : > { %s1408_s16 = sshll.u32 %s1531_s14, 4  ;;  %s1409_s16 = int_to_ptr.vmem [resolvable:$false] %s1408_s16 }
 0x423   : > { %p1406_p4 = pnand %p1405_p12, %p1668_p3  ;;  %s1410_s11 = scalar_lea.vmem %s1409_s16, 256 }
 0x424   : > { %p1411_p5 = scmp.lt.s32.totalorder %s1853_s26, %s1409_s16  ;;  %p1412_p6 = scmp.lt.s32.totalorder %s1410_s11, %s1404_s30 }
 0x425   : > { %s1976_s17 = smov %s1975_s23  ;;  %s1851_s27 = scalar_lea.hbm %s1975_s23, %s1205_s18 }
 0x426   : > { %p1407_p2 = pneg %p1406_p4  ;;  %p1413_p8 = por %p1412_p6, %p1411_p5 }
 0x428   : > { %p1414_p9 = pnand %p1413_p8, %p1407_p2 }
 0x4df   : > { %v930_v9 = vpop.f32.mrb[8].mxu1 }
 0x4e0   : > { %v936_v10 = vadd.f32 %v930_v9, %v886_v0  ;;  %v1268_v11 = vpop.f32.mrb[9].mxu1 }
 0x4e1   : > { %v933_v12 = vpop.f32.mrb[10].mxu1 }
 0x4e2   : > { %937 = vst.msk [vmem:[%s1805_s24] sm:$0xff] %vm619_vm1, %v936_v10  ;;  %v1269_v13 = vpop.f32.mrb[11].mxu1 }
 0x4e3   : > { %1417 = shalt.err (!%p1414_p9)
}
 0x4e4   : > { %s1418_s24 = scalar_lea.hbm %s1851_s27, 128  ;;  %s1422_s0 = scalar_lea.hbm %s1976_s17, 256 }
 0x4e5   : > { %p1419_p10 = scmp.ne.s32.totalorder %s1851_s27, %s1418_s24  ;;  %p1423_p1 = scmp.lt.u32.totalorder %s1851_s27, %s1976_s17 }
 0x4e6   : > { %p1424_p12 = scmp.lt.u32.totalorder %s1422_s0, %s1418_s24  ;;  %p1426_p2 = scmp.lt.u32.totalorder %s1418_s24, %s1851_s27 }
 0x4e7   : > { %p1420_p11 = pnand %p1419_p10, %p1668_p3 }
 0x4e8   : > { %p1425_p4 = por %p1424_p12, %p1423_p1 }
 0x4e9   : > { %p1421_p0 = pneg %p1420_p11 }
 0x4ea   : > { %p1427_p5 = por %p1426_p2, %p1425_p4 }
 0x4ec   : > { %p1428_p6 = pnand %p1427_p5, %p1421_p0 }
 0x4ee   : > { %1431 = shalt.err (!%p1428_p6)
}
 0x4ef   : > { %1270 = dma.vmem_to_hbm [thread:$0]  (%p1668_p3), %s1853_s26, 128, %s1851_s27, %s939_s28  }
 0x4f0 PF: > { %s1978_s8 = sld [smem:[#allocation9_spill]]  ;;  %p1281_p8 = scmp.ge.s32.totalorder %s1526_s13, 2 }
 0x4f2   : > { %p1275_p9 = pnand %p1281_p8, %p1685_p7 }
 0x4f6   : > { %s984_s23 = sand.u32 1, %s1978_s8  }
 0x4f7   : > { %s985_s20 = scalar_lea.sflag [#allocation3], %s984_s23 }
 0x4f8   : > { %1477 = dma.done.wait (!%p1275_p9), %s985_s20, 128  }
 0x4f9   : > { %1479 = vsyncadd (!%p1275_p9), %s985_s20, 4294967168  ;;  %s993_s14 = sand.u32 1, %s1486_s21   ;;  %p1278_p10 = pnand %p1281_p8, %p1709_p13 }
 0x4fa   : > { %s994_s1 = scalar_lea.sflag [#allocation5], %s993_s14 }
 0x4fb   : > { %1481 = dma.done.wait (!%p1278_p10), %s994_s1, 128  }
 0x4fc   : > { %1483 = vsyncadd (!%p1278_p10), %s994_s1, 4294967168  ;;  %s29_s13 = sadd.s32 1, %s1526_s13   ;;  %s1980_s26 = sld [smem:[#allocation8_spill]] }
 0x4fd   : > { %p26_p3 = scmp.ge.s32.totalorder %s29_s13, 10   ;;  %s1981_s23 = sld [smem:[#allocation17_spill]] }
 0x4fe   : > { %s1982_s10 = sld [smem:[#allocation10_spill]]  ;;  %s1983_s27 = sld [smem:[#allocation16_spill]] }
 0x4ff   : > { %s1984_s28 = sld [smem:[#allocation11_spill]]  ;;  %s1985_s16 = sld [smem:[#allocation12_spill]] }
 0x500   : > { %s1986_s29 = sld [smem:[#allocation13_spill]]  ;;  %s1987_s30 = sld [smem:[#allocation15_spill]] }
 0x501   : > { %s1988_s21 = smov %s1490_s22  ;;  %s1990_s24 = smov %s1502_s25 }
 0x502   : > { %s1989_s22 = smov %s1980_s26  ;;  %28 = sbr.rel (!%p26_p3) target bundleno = 16 (0x10), region = 147 }
 0x504   : > { %s1991_s25 = smov %s1982_s10  ;;  %s1992_s26 = smov %s1983_s27 }
 0x505   : > { %s1993_s27 = smov %s1984_s28  ;;  %s1994_s28 = smov %s1985_s16 }
 0x509   :  { %999 = vsyncpa [#allocation3], 1 }
 0x50a   :  { %1001 = vsyncpa [#allocation3 + $0x1], 1 }
 0x50b   :  { %1002 = vsyncpa [#allocation5], 1 }
 0x50c   :  { %1004 = vsyncpa [#allocation5 + $0x1], 1 }

</bundles_post_ra>
